<compile_context>
chip_gen: v5e
topology: v5e:2x2
jax: 0.10.0
libtpu: 0.0.40
codegen_flags: <defaults>
</compile_context>

<pallas_src>
import jax
import jax.numpy as jnp
from jax.experimental import pallas as pl
from jax.experimental.pallas import tpu as pltpu


def _round_up(x, m):
    return (x + m - 1) // m * m


def _fused_embedding_kernel(ids_ref, table_ref, out_ref):
    """ids_ref:   (T, n_emb) int32 ids already offset into the fused vocab space.
    table_ref: (Vp, E_total) f32 block-diagonal fused embedding table (resident).
    out_ref:   (T, E_total) f32 concatenated embeddings (true width, no pad)."""
    T = out_ref.shape[0]
    Vp = table_ref.shape[0]
    n_emb = ids_ref.shape[1]

    # One (T, Vp) one-hot built as an OR of per-table compares.  Per-table id
    # ranges are disjoint after offsetting, so OR == sum of one-hots.
    iota = jax.lax.broadcasted_iota(jnp.int32, (T, Vp), 1)
    hit = iota == ids_ref[:, 0][:, None]
    for k in range(1, n_emb):
        hit = hit | (iota == ids_ref[:, k][:, None])
    one_hot = hit.astype(jnp.float32)

    # Single MXU matmul produces the full concatenated embedding block.
    # HIGHEST precision keeps the 0/1 pass-through of f32 rows (near-)exact.
    out_ref[...] = jnp.dot(one_hot, table_ref[...],
                           preferred_element_type=jnp.float32,
                           precision=jax.lax.Precision.HIGHEST)


def build_fused_embedding(char_table, feat_tables):
    """Build the block-diagonal fused table ONCE at model setup (hoisted out of
    the per-call forward so no per-step zero-fill / update-slice HBM pass)."""
    tables = [char_table] + list(feat_tables)
    vocab_sizes = tuple(int(t.shape[0]) for t in tables)
    embed_sizes = tuple(int(t.shape[1]) for t in tables)
    V_total = sum(vocab_sizes)
    E_total = sum(embed_sizes)
    Vp = _round_up(max(V_total, 8), 128)  # minimal lane pad for the one-hot axis

    fused = jnp.zeros((Vp, E_total), jnp.float32)
    row_offsets = []
    r = c = 0
    for t, V, E in zip(tables, vocab_sizes, embed_sizes):
        fused = fused.at[r:r + V, c:c + E].set(t.astype(jnp.float32))
        row_offsets.append(r)
        r += V
        c += E
    return fused, tuple(row_offsets), vocab_sizes


def embedding_forward(src, feats, fused_table, row_offsets, vocab_sizes, *,
                      token_tile=1024, padding_idx=1):
    """src: (B, S) int ids; feats: list of (B, S) int ids.
    fused_table/row_offsets/vocab_sizes: from build_fused_embedding.
    Returns (B, S, sum(E_k)) f32, matching torch.cat of nn.Embedding lookups."""
    B, S = src.shape
    N = B * S
    Vp, E_total = int(fused_table.shape[0]), int(fused_table.shape[1])
    n_emb = len(row_offsets)

    # Flatten ids, clamp per-table (no silent cross-table reads on bad ids),
    # and offset each stream into the fused vocab space.
    id_cols = [src.reshape(N)] + [f.reshape(N) for f in feats]
    ids = jnp.stack(
        [jnp.clip(col.astype(jnp.int32), 0, V - 1) + off
         for col, off, V in zip(id_cols, row_offsets, vocab_sizes)],
        axis=1)  # (N, n_emb)

    # Large token tile to amortise per-grid-step overhead; cap for tiny inputs.
    tile = min(token_tile, _round_up(N, 8))
    tile = _round_up(tile, 8)
    Np = _round_up(N, tile)
    if Np != N:
        pad_ids = jnp.asarray([off + padding_idx for off in row_offsets],
                              dtype=jnp.int32)
        ids = jnp.concatenate(
            [ids, jnp.broadcast_to(pad_ids, (Np - N, n_emb))], axis=0)

    grid = (Np // tile,)

    # VMEM budget: double-buffered id + output blocks, double-buffered resident
    # table, plus the (T,Vp) iota/one-hot matmul-LHS temporaries and headroom.
    vmem_bytes = (2 * tile * n_emb * 4
                  + 2 * tile * E_total * 4
                  + 2 * Vp * E_total * 4
                  + 2 * tile * Vp * 4
                  + (8 << 20))
    vmem_bytes = int(max(vmem_bytes, 16 << 20))

    out_flat = pl.pallas_call(
        _fused_embedding_kernel,
        out_shape=jax.ShapeDtypeStruct((Np, E_total), jnp.float32),
        grid_spec=pltpu.PrefetchScalarGridSpec(
            num_scalar_prefetch=0,
            grid=grid,
            in_specs=[
                pl.BlockSpec((tile, n_emb), lambda i: (i, 0)),   # id tile
                pl.BlockSpec((Vp, E_total), lambda i: (0, 0)),   # fused table
            ],
            out_specs=pl.BlockSpec((tile, E_total), lambda i: (i, 0)),
        ),
        compiler_params=pltpu.CompilerParams(
            dimension_semantics=("parallel",),
            vmem_limit_bytes=vmem_bytes),
    )(ids, fused_table)

    # Dropout is identity in eval mode.  Row slice is a no-op when tile | N.
    return out_flat[:N].reshape(B, S, E_total)


def _init_embedding_table(key, vocab_size, embed_size, padding_idx=1):
    """nn.Embedding default init: N(0,1); padding_idx row is zero."""
    w = jax.random.normal(key, (vocab_size, embed_size), dtype=jnp.float32)
    return w.at[padding_idx].set(0.0)


def _reference(src, feats, char_table, feat_tables):
    outs = [jnp.take(char_table, src, axis=0)]
    for f, t in zip(feats, feat_tables):
        outs.append(jnp.take(t, f, axis=0))
    return jnp.concatenate(outs, axis=2)


if __name__ == "__main__":
    # Small, deterministic example consistent with the module's forward.
    source_vocab_size = 50
    feat_vocab_sizes = [10, 12]
    embed_size = 32
    feat_embed_size = 8
    B, S = 2, 8

    key = jax.random.PRNGKey(0)
    k_char, k_f0, k_f1, k_src, k_feat0, k_feat1 = jax.random.split(key, 6)

    char_table = _init_embedding_table(k_char, source_vocab_size, embed_size)
    feat_tables = [
        _init_embedding_table(k_f0, feat_vocab_sizes[0], feat_embed_size),
        _init_embedding_table(k_f1, feat_vocab_sizes[1], feat_embed_size),
    ]

    src = jax.random.randint(k_src, (B, S), 0, source_vocab_size, dtype=jnp.int32)
    feats = [
        jax.random.randint(k_feat0, (B, S), 0, feat_vocab_sizes[0], dtype=jnp.int32),
        jax.random.randint(k_feat1, (B, S), 0, feat_vocab_sizes[1], dtype=jnp.int32),
    ]

    # Fused table built once at setup (hoisted out of the forward pass).
    fused_table, row_offsets, vocab_sizes = build_fused_embedding(
        char_table, feat_tables)

    out = embedding_forward(src, feats, fused_table, row_offsets, vocab_sizes)
    out = jax.block_until_ready(out)

    ref = _reference(src, feats, char_table, feat_tables)
    assert out.shape == (B, S, embed_size + 2 * feat_embed_size), out.shape
    assert jnp.allclose(out, ref, atol=1e-5, rtol=1e-5), "mismatch vs JAX reference"

    print("KERNEL_OK")
</pallas_src>

<mosaic_0001>
module attributes {stable_mosaic.version = 11 : i64} {
  func.func @_fused_embedding_kernel(%arg0: i32, %arg1: memref<16x3xi32, #tpu.memory_space<vmem>>, %arg2: memref<128x48xf32, #tpu.memory_space<vmem>>, %arg3: memref<16x48xf32, #tpu.memory_space<vmem>>) attributes {dimension_semantics = [#tpu.dimension_semantics<parallel>], iteration_bounds = array<i64: 1>, scalar_prefetch = 0 : i64, scratch_operands = 0 : i64, tpu.core_type = #tpu.core_type<tc>, window_params = [{transform_indices = @transform_0, window_bounds = array<i64: 16, 3>}, {pipeline_mode = #tpu.pipeline_mode<synchronous>, transform_indices = @transform_1, window_bounds = array<i64: 128, 48>}, {transform_indices = @transform_2, window_bounds = array<i64: 16, 48>}]} {
    %0 = tpu.iota {dimensions = array<i32: 1>} : vector<16x128xi32>
    %c0 = arith.constant 0 : index
    %c0_0 = arith.constant 0 : index
    %1 = vector.load %arg1[%c0, %c0_0] : memref<16x3xi32, #tpu.memory_space<vmem>>, vector<16x1xi32>
    %2 = vector.shape_cast %1 : vector<16x1xi32> to vector<16xi32>
    %3 = vector.shape_cast %2 : vector<16xi32> to vector<16x1xi32>
    %4 = vector.broadcast %3 : vector<16x1xi32> to vector<16x128xi32>
    %5 = arith.cmpi eq, %0, %4 : vector<16x128xi32>
    %c0_1 = arith.constant 0 : index
    %c1 = arith.constant 1 : index
    %6 = vector.load %arg1[%c0_1, %c1] : memref<16x3xi32, #tpu.memory_space<vmem>>, vector<16x1xi32>
    %7 = vector.shape_cast %6 : vector<16x1xi32> to vector<16xi32>
    %8 = vector.shape_cast %7 : vector<16xi32> to vector<16x1xi32>
    %9 = vector.broadcast %8 : vector<16x1xi32> to vector<16x128xi32>
    %10 = arith.cmpi eq, %0, %9 : vector<16x128xi32>
    %11 = arith.ori %5, %10 : vector<16x128xi1>
    %c0_2 = arith.constant 0 : index
    %c2 = arith.constant 2 : index
    %12 = vector.load %arg1[%c0_2, %c2] : memref<16x3xi32, #tpu.memory_space<vmem>>, vector<16x1xi32>
    %13 = vector.shape_cast %12 : vector<16x1xi32> to vector<16xi32>
    %14 = vector.shape_cast %13 : vector<16xi32> to vector<16x1xi32>
    %15 = vector.broadcast %14 : vector<16x1xi32> to vector<16x128xi32>
    %16 = arith.cmpi eq, %0, %15 : vector<16x128xi32>
    %17 = arith.ori %11, %16 : vector<16x128xi1>
    %18 = arith.extui %17 : vector<16x128xi1> to vector<16x128xi32>
    %19 = arith.sitofp %18 : vector<16x128xi32> to vector<16x128xf32>
    %c0_3 = arith.constant 0 : index
    %c0_4 = arith.constant 0 : index
    %20 = vector.load %arg2[%c0_3, %c0_4] : memref<128x48xf32, #tpu.memory_space<vmem>>, vector<128x48xf32>
    %cst = arith.constant dense<0.000000e+00> : vector<16x48xf32>
    %21 = tpu.matmul %19, %20, %cst {dimension_numbers = #tpu.dot_dimension_numbers<[1], [0], [0], [1], [0, 0, 1, 1], [], []>, precision = #tpu.contract_precision<fp32>} : vector<16x128xf32>, vector<128x48xf32>, vector<16x48xf32> -> vector<16x48xf32>
    %c0_5 = arith.constant 0 : index
    %c0_6 = arith.constant 0 : index
    %22 = vector.load %arg3[%c0_5, %c0_6] : memref<16x48xf32, #tpu.memory_space<vmem>>, vector<16x48xf32>
    tpu.vector_store %arg3[%c0_5, %c0_6], %21 {strides = array<i32>} : memref<16x48xf32, #tpu.memory_space<vmem>>, vector<16x48xf32>,
    return
  }
  func.func @transform_0(%arg0: i32) -> (i32, i32) {
    %c0_i32 = arith.constant 0 : i32
    %c0_i32_0 = arith.constant 0 : i32
    return %arg0, %c0_i32 : i32, i32
  }
  func.func @transform_1(%arg0: i32) -> (i32, i32) {
    %c0_i32 = arith.constant 0 : i32
    %c0_i32_0 = arith.constant 0 : i32
    %c0_i32_1 = arith.constant 0 : i32
    return %c0_i32, %c0_i32_0 : i32, i32
  }
  func.func @transform_2(%arg0: i32) -> (i32, i32) {
    %c0_i32 = arith.constant 0 : i32
    %c0_i32_0 = arith.constant 0 : i32
    return %arg0, %c0_i32 : i32, i32
  }
}

</mosaic_0001>

<bundles_post_ra>
// kernel: tpu_custom_call.1
= control target key start
LH: loop header
LB: loop body
LE: loop exit
PB: predicated region body
PF: predicated region fallthrough
CT: control target
= control target key end

     0   :  { %v538_v2 = vmov 2   ;;  %v539_v3 = vmov 0   ;;  %v540_v15 = vmov 1   ;;  %s842_s0 = inlined_call_operand.vmem [shape: s32[16,3], index: 0, kind: input, shape index: {}]   ;;  %s843_s1 = inlined_call_operand.vmem [shape: f32[128,48], index: 1, kind: input, shape index: {}]   ;;  %s844_s2 = inlined_call_operand.hbm [shape: f32[16,48], index: 2, kind: output, shape index: {}]  }
   0x1   :  { %v564_v0 = vld [vmem:[%s842_s0] sm:$0xff]  ;;  %v63_v1 = vld [vmem:[%s843_s1 + $0x78] sm:$0xff]  ;;  %507 = vset.pattern.permute.xlu1 %v538_v2  ;;  %505 = vset.pattern.permute.xlu0 %v539_v3  ;;  %v62_v5 = vld [vmem:[%s843_s1 + $0x70] sm:$0xff] }
   0x2   :  { %v570_v4 = vand.u32 4294901760, %v63_v1  ;;  %v61_v6 = vld [vmem:[%s843_s1 + $0x68] sm:$0xff]  ;;  %v60_v7 = vld [vmem:[%s843_s1 + $0x60] sm:$0xff]  ;;  %35 = vperm.xlu1 %507, %v564_v0   ;;  %17 = vperm.xlu0 %505, %v564_v0   ;;  %v583_v8 = vand.u32 4294901760, %v62_v5  ;;  %v59_v11 = vld [vmem:[%s843_s1 + $0x58] sm:$0xff] }
   0x3   :  { %v585_v9 = vand.u32 4294901760, %v61_v6  ;;  %v587_v10 = vand.u32 4294901760, %v60_v7  ;;  %v58_v12 = vld [vmem:[%s843_s1 + $0x50] sm:$0xff]  ;;  %v57_v13 = vld [vmem:[%s843_s1 + $0x48] sm:$0xff]  ;;  %509 = vset.pattern.permute.xlu2 %v540_v15  ;;  %v603_v17 = vand.u32 4294901760, %v59_v11  ;;  %v56_v20 = vld [vmem:[%s843_s1 + $0x40] sm:$0xff] }
   0x4   :  { %v15_v14 = vld [vmem:[%s842_s0 + $0x8] sm:$0xff]  ;;  %v114_v16 = vsub.f32 %v63_v1, %v570_v4  ;;  %278 = vmatpush.msra.mxu3 %v570_v4  ;;  %v605_v18 = vand.u32 4294901760, %v58_v12  ;;  %v607_v19 = vand.u32 4294901760, %v57_v13  ;;  %v120_v21 = vsub.f32 %v62_v5, %v583_v8  ;;  %65 = vmatpush.msra.mxu0 %v570_v4 }
   0x5   :  { %28 = vperm.xlu2 %509, %v15_v14   ;;  %v126_v22 = vsub.f32 %v61_v6, %v585_v9  ;;  %v132_v23 = vsub.f32 %v60_v7, %v587_v10  ;;  %v138_v25 = vsub.f32 %v59_v11, %v603_v17  ;;  %v620_v26 = vand.u32 4294901760, %v56_v20 }
   0x6   :  { %v616_v24 = vand.u32 4294901760, %v114_v16  ;;  %220 = vmatpush.msra.mxu2 %v114_v16  ;;  %280 = vmatpush.msra.mxu3 %v583_v8 }
   0x7   :  { %7 = vsyncpa [#allocation3], 0  ;;  %v622_v27 = vand.u32 4294901760, %v120_v21  ;;  %v624_v28 = vand.u32 4294901760, %v126_v22  ;;  %v626_v29 = vand.u32 4294901760, %v132_v23  ;;  %v144_v30 = vsub.f32 %v58_v12, %v605_v18  ;;  %67 = vmatpush.msra.mxu0 %v583_v8  ;;  %v55_v36 = vld [vmem:[%s843_s1 + $0x38] sm:$0xff] }
   0x8   :  { %v116_v31 = vsub.f32 %v114_v16, %v616_v24  ;;  %223 = vmatpush.msra.mxu2 %v120_v21  ;;  %282 = vmatpush.msra.mxu3 %v585_v9  ;;  %v150_v32 = vsub.f32 %v57_v13, %v607_v19  ;;  %v635_v35 = vand.u32 4294901760, %v138_v25  ;;  %v156_v38 = vsub.f32 %v56_v20, %v620_v26  ;;  %v54_v39 = vld [vmem:[%s843_s1 + $0x30] sm:$0xff]  ;;  %v53_v40 = vld [vmem:[%s843_s1 + $0x28] sm:$0xff]  ;;  %v52_v46 = vld [vmem:[%s843_s1 + $0x20] sm:$0xff]  ;;  %s445_s19 = sshll.u32 %s844_s2, 4  ;;  %s544_s20 = smov 128   ;;  %s446_s19 = int_to_ptr.hbm [resolvable:$true] %s445_s19 }
   0x9   :  { %v122_v33 = vsub.f32 %v120_v21, %v622_v27  ;;  %v128_v34 = vsub.f32 %v126_v22, %v624_v28  ;;  %69 = vmatpush.msra.mxu0 %v585_v9  ;;  %v134_v42 = vsub.f32 %v132_v23, %v626_v29  ;;  %v650_v43 = vand.u32 4294901760, %v144_v30  ;;  %v51_v53 = vld [vmem:[%s843_s1 + $0x18] sm:$0xff]  ;;  %v50_v59 = vld [vmem:[%s843_s1 + $0x10] sm:$0xff]  ;;  %v49_v1 = vld [vmem:[%s843_s1 + $0x8] sm:$0xff]  ;;  %s545_s21 = smov 8  }
   0xa   :  { %v117_v37 = vand.u32 4294901760, %v116_v31  ;;  %226 = vmatpush.msra.mxu2 %v126_v22  ;;  %284 = vmatpush.msra.mxu3 %v587_v10  ;;  %v653_v44 = vand.u32 4294901760, %v150_v32  ;;  %v655_v45 = vand.u32 4294901760, %v55_v36  ;;  %v140_v48 = vsub.f32 %v138_v25, %v635_v35  ;;  %v48_v12 = vld [vmem:[%s843_s1] sm:$0xff]  ;;  %s543_s1 = smov [#allocation2]  }
   0xb   :  { %508 = vset.pattern.permute.xlu1 %v539_v3  ;;  %506 = vset.pattern.permute.xlu0 %v540_v15  ;;  %v123_v41 = vand.u32 4294901760, %v122_v33  ;;  %v129_v47 = vand.u32 4294901760, %v128_v34  ;;  %v662_v49 = vand.u32 4294901760, %v54_v39  ;;  %v664_v50 = vand.u32 4294901760, %v53_v40  ;;  %s443_s16 = sshll.u32 %s543_s1, 4  ;;  %s444_s16 = int_to_ptr.vmem [resolvable:$true] %s443_s16 }
   0xc   :  { %20 = vperm.xlu1 %508, %v15_v14   ;;  %25 = vperm.xlu0 %506, %v564_v0   ;;  %v666_v51 = vand.u32 4294901760, %v156_v38  ;;  %v162_v52 = vsub.f32 %v55_v36, %v655_v45  ;;  %v135_v54 = vand.u32 4294901760, %v134_v42  ;;  %v146_v55 = vsub.f32 %v144_v30, %v650_v43 }
   0xd   :  { %510 = vset.pattern.permute.xlu2 %v538_v2  ;;  %118 = vmatpush.msra.mxu1 %v117_v37  ;;  %v168_v56 = vsub.f32 %v54_v39, %v662_v49  ;;  %v675_v57 = vand.u32 4294901760, %v52_v46  ;;  %v152_v58 = vsub.f32 %v150_v32, %v653_v44  ;;  %v141_v60 = vand.u32 4294901760, %v140_v48 }
   0xe   :  { %38 = vperm.xlu2 %510, %v15_v14   ;;  %229 = vmatpush.msra.mxu2 %v132_v23  ;;  %v683_v61 = vand.u32 4294901760, %v162_v52  ;;  %v174_v62 = vsub.f32 %v53_v40, %v664_v50  ;;  %v686_v63 = vand.u32 4294901760, %v51_v53  ;;  %v158_v0 = vsub.f32 %v156_v38, %v666_v51 }
   0xf   :  { %124 = vmatpush.msra.mxu1 %v123_v41  ;;  %286 = vmatpush.msra.mxu3 %v603_v17  ;;  %v147_v3 = vand.u32 4294901760, %v146_v55  ;;  %v694_v5 = vand.u32 4294901760, %v168_v56  ;;  %v180_v6 = vsub.f32 %v52_v46, %v675_v57  ;;  %v697_v7 = vand.u32 4294901760, %v50_v59 }
  0x10   :  { %232 = vmatpush.msra.mxu2 %v138_v25  ;;  %71 = vmatpush.msra.mxu0 %v587_v10  ;;  %v153_v11 = vand.u32 4294901760, %v152_v58  ;;  %v164_v13 = vsub.f32 %v162_v52, %v683_v61  ;;  %v705_v14 = vand.u32 4294901760, %v174_v62  ;;  %v186_v15 = vsub.f32 %v51_v53, %v686_v63 }
  0x11   :  { %130 = vmatpush.msra.mxu1 %v129_v47  ;;  %288 = vmatpush.msra.mxu3 %v605_v18  ;;  %v708_v16 = vand.u32 4294901760, %v49_v1  ;;  %v159_v20 = vand.u32 4294901760, %v158_v0  ;;  %v170_v21 = vsub.f32 %v168_v56, %v694_v5  ;;  %v713_v22 = vand.u32 4294901760, %v180_v6 }
  0x12   :  { %235 = vmatpush.msra.mxu2 %v144_v30  ;;  %73 = vmatpush.msra.mxu0 %v603_v17  ;;  %v192_v23 = vsub.f32 %v50_v59, %v697_v7  ;;  %v716_v25 = vand.u32 4294901760, %v48_v12  ;;  %v165_v30 = vand.u32 4294901760, %v164_v13  ;;  %v176_v31 = vsub.f32 %v174_v62, %v705_v14 }
  0x13   :  { %136 = vmatpush.msra.mxu1 %v135_v54  ;;  %290 = vmatpush.msra.mxu3 %v607_v19  ;;  %v198_v33 = vsub.f32 %v49_v1, %v708_v16  ;;  %v171_v34 = vand.u32 4294901760, %v170_v21  ;;  %v182_v36 = vsub.f32 %v180_v6, %v713_v22  ;;  %vm436_vm10 = vcmask 392192  }
  0x14   :  { %238 = vmatpush.msra.mxu2 %v150_v32  ;;  %75 = vmatpush.msra.mxu0 %v605_v18  ;;  %v721_v32 = vand.u32 4294901760, %v186_v15  ;;  %v727_v37 = vand.u32 4294901760, %v192_v23  ;;  %v177_v39 = vand.u32 4294901760, %v176_v31 }
  0x15   :  { %142 = vmatpush.msra.mxu1 %v141_v60  ;;  %292 = vmatpush.msra.mxu3 %v620_v26  ;;  %v733_v41 = vand.u32 4294901760, %v198_v33  ;;  %v183_v42 = vand.u32 4294901760, %v182_v36 }
  0x16   :  { %241 = vmatpush.msra.mxu2 %v156_v38  ;;  %77 = vmatpush.msra.mxu0 %v607_v19  ;;  %v204_v38 = vsub.f32 %v48_v12, %v716_v25  ;;  %v188_v40 = vsub.f32 %v186_v15, %v721_v32  ;;  %v194_v46 = vsub.f32 %v192_v23, %v727_v37 }
  0x17   :  { %148 = vmatpush.msra.mxu1 %v147_v3  ;;  %294 = vmatpush.msra.mxu3 %v655_v45 }
  0x18   :  { %244 = vmatpush.msra.mxu2 %v162_v52  ;;  %79 = vmatpush.msra.mxu0 %v620_v26  ;;  %v738_v47 = vand.u32 4294901760, %v204_v38  ;;  %v189_v48 = vand.u32 4294901760, %v188_v40  ;;  %v200_v52 = vsub.f32 %v198_v33, %v733_v41  ;;  %v195_v53 = vand.u32 4294901760, %v194_v46 }
  0x19   :  { %154 = vmatpush.msra.mxu1 %v153_v11  ;;  %296 = vmatpush.msra.mxu3 %v662_v49 }
  0x1a   :  { %247 = vmatpush.msra.mxu2 %v168_v56  ;;  %81 = vmatpush.msra.mxu0 %v655_v45  ;;  %v206_v54 = vsub.f32 %v204_v38, %v738_v47  ;;  %v201_v55 = vand.u32 4294901760, %v200_v52 }
  0x1b   :  { %160 = vmatpush.msra.mxu1 %v159_v20  ;;  %298 = vmatpush.msra.mxu3 %v664_v50 }
  0x1c   :  { %250 = vmatpush.msra.mxu2 %v174_v62  ;;  %83 = vmatpush.msra.mxu0 %v662_v49  ;;  %v207_v56 = vand.u32 4294901760, %v206_v54 }
  0x1d   :  { %166 = vmatpush.msra.mxu1 %v165_v30  ;;  %300 = vmatpush.msra.mxu3 %v675_v57 }
  0x1e   :  { %253 = vmatpush.msra.mxu2 %v180_v6  ;;  %85 = vmatpush.msra.mxu0 %v664_v50 }
  0x1f   :  { %172 = vmatpush.msra.mxu1 %v171_v34  ;;  %302 = vmatpush.msra.mxu3 %v686_v63 }
  0x20   :  { %256 = vmatpush.msra.mxu2 %v186_v15  ;;  %87 = vmatpush.msra.mxu0 %v675_v57 }
  0x21   :  { %178 = vmatpush.msra.mxu1 %v177_v39  ;;  %304 = vmatpush.msra.mxu3 %v697_v7 }
  0x22   :  { %259 = vmatpush.msra.mxu2 %v192_v23  ;;  %89 = vmatpush.msra.mxu0 %v686_v63 }
  0x23   :  { %184 = vmatpush.msra.mxu1 %v183_v42  ;;  %306 = vmatpush.msra.mxu3 %v708_v16 }
  0x24   :  { %262 = vmatpush.msra.mxu2 %v198_v33  ;;  %91 = vmatpush.msra.mxu0 %v697_v7 }
  0x25   :  { %190 = vmatpush.msra.mxu1 %v189_v48  ;;  %308 = vmatpush.msra.mxu3 %v716_v25 }
  0x26   :  { %265 = vmatpush.msra.mxu2 %v204_v38  ;;  %93 = vmatpush.msra.mxu0 %v708_v16 }
  0x27   :  { %481 = vmatpush.msrb.mxu3 %v570_v4  ;;  %196 = vmatpush.msra.mxu1 %v195_v53 }
  0x28   :  { %465 = vmatpush.msrb.mxu2 %v616_v24  ;;  %95 = vmatpush.msra.mxu0 %v716_v25 }
  0x29   :  { %482 = vmatpush.msrb.mxu3 %v583_v8  ;;  %202 = vmatpush.msra.mxu1 %v201_v55 }
  0x2a   :  { %466 = vmatpush.msrb.mxu2 %v622_v27  ;;  %325 = vmatpush.msrb.mxu0 %v616_v24 }
  0x2b   :  { %483 = vmatpush.msrb.mxu3 %v585_v9  ;;  %208 = vmatpush.msra.mxu1 %v207_v56 }
  0x2c   :  { %467 = vmatpush.msrb.mxu2 %v624_v28  ;;  %329 = vmatpush.msrb.mxu0 %v622_v27  ;;  %v541_v27 = vmov 1.0  }
  0x2d   :  { %396 = vmatpush.msrb.mxu1 %v570_v4  ;;  %484 = vmatpush.msrb.mxu3 %v587_v10 }
  0x2e   :  { %468 = vmatpush.msrb.mxu2 %v626_v29  ;;  %333 = vmatpush.msrb.mxu0 %v624_v28  ;;  %v542_v28 = vmov 0.0  }
  0x2f   :  { %398 = vmatpush.msrb.mxu1 %v583_v8  ;;  %485 = vmatpush.msrb.mxu3 %v603_v17 }
  0x30   :  { %469 = vmatpush.msrb.mxu2 %v635_v35  ;;  %337 = vmatpush.msrb.mxu0 %v626_v29 }
  0x31   :  { %400 = vmatpush.msrb.mxu1 %v585_v9  ;;  %486 = vmatpush.msrb.mxu3 %v605_v18 }
  0x32   :  { %470 = vmatpush.msrb.mxu2 %v650_v43  ;;  %341 = vmatpush.msrb.mxu0 %v635_v35 }
  0x33   :  { %402 = vmatpush.msrb.mxu1 %v587_v10  ;;  %487 = vmatpush.msrb.mxu3 %v607_v19  ;;  %v12_v10 = vlaneseq }
  0x34   :  { %471 = vmatpush.msrb.mxu2 %v653_v44  ;;  %345 = vmatpush.msrb.mxu0 %v650_v43 }
  0x35   :  { %404 = vmatpush.msrb.mxu1 %v603_v17  ;;  %488 = vmatpush.msrb.mxu3 %v620_v26  ;;  %v13_v17 = vand.u32 127, %v12_v10 }
  0x36   :  { %472 = vmatpush.msrb.mxu2 %v666_v51  ;;  %349 = vmatpush.msrb.mxu0 %v653_v44 }
  0x37   :  { %406 = vmatpush.msrb.mxu1 %v605_v18  ;;  %489 = vmatpush.msrb.mxu3 %v655_v45 }
  0x38   :  { %473 = vmatpush.msrb.mxu2 %v683_v61  ;;  %353 = vmatpush.msrb.mxu0 %v666_v51 }
  0x39   :  { %408 = vmatpush.msrb.mxu1 %v607_v19  ;;  %490 = vmatpush.msrb.mxu3 %v662_v49 }
  0x3a   :  { %474 = vmatpush.msrb.mxu2 %v694_v5  ;;  %357 = vmatpush.msrb.mxu0 %v683_v61 }
  0x3b   :  { %410 = vmatpush.msrb.mxu1 %v620_v26  ;;  %491 = vmatpush.msrb.mxu3 %v664_v50 }
  0x3c   :  { %475 = vmatpush.msrb.mxu2 %v705_v14  ;;  %361 = vmatpush.msrb.mxu0 %v694_v5 }
  0x3d   :  { %412 = vmatpush.msrb.mxu1 %v655_v45  ;;  %492 = vmatpush.msrb.mxu3 %v675_v57 }
  0x3e   :  { %476 = vmatpush.msrb.mxu2 %v713_v22  ;;  %365 = vmatpush.msrb.mxu0 %v705_v14 }
  0x3f   :  { %414 = vmatpush.msrb.mxu1 %v662_v49  ;;  %493 = vmatpush.msrb.mxu3 %v686_v63 }
  0x40   :  { %477 = vmatpush.msrb.mxu2 %v721_v32  ;;  %369 = vmatpush.msrb.mxu0 %v713_v22 }
  0x41   :  { %416 = vmatpush.msrb.mxu1 %v664_v50  ;;  %494 = vmatpush.msrb.mxu3 %v697_v7 }
  0x42   :  { %478 = vmatpush.msrb.mxu2 %v727_v37  ;;  %373 = vmatpush.msrb.mxu0 %v721_v32 }
  0x43   :  { %418 = vmatpush.msrb.mxu1 %v675_v57  ;;  %495 = vmatpush.msrb.mxu3 %v708_v16 }
  0x44   :  { %479 = vmatpush.msrb.mxu2 %v733_v41  ;;  %377 = vmatpush.msrb.mxu0 %v727_v37 }
  0x45   :  { %420 = vmatpush.msrb.mxu1 %v686_v63  ;;  %496 = vmatpush.msrb.mxu3 %v716_v25 }
  0x46   :  { %480 = vmatpush.msrb.mxu2 %v738_v47  ;;  %511 = vset.pattern.permute.xlu0 %v538_v2 }
  0x47   :  { %422 = vmatpush.msrb.mxu1 %v697_v7  ;;  %381 = vmatpush.msrb.mxu0 %v733_v41 }
  0x49   :  { %424 = vmatpush.msrb.mxu1 %v708_v16  ;;  %385 = vmatpush.msrb.mxu0 %v738_v47 }
  0x4b   :  { %426 = vmatpush.msrb.mxu1 %v716_v25 }
  0x5f   :  { %v29_v4 = vpop.permute.xlu2 %28 }
  0x60   :  { %vm31_vm0 = vcmp.eq.s32.totalorder %v13_v17, %v29_v4 }
  0x68   :  { %v39_v18 = vpop.permute.xlu2 %38 }
  0x69   :  { %vm41_vm5 = vcmp.eq.s32.totalorder %v13_v17, %v39_v18 }
  0x74   :  { %v18_v8 = vpop.permute.xlu0 %17  ;;  %v36_v9 = vpop.permute.xlu1 %35 }
  0x75   :  { %vm22_vm3 = vcmp.eq.s32.totalorder %v13_v17, %v18_v8  ;;  %vm40_vm6 = vcmp.eq.s32.totalorder %v13_v17, %v36_v9 }
  0x7e   :  { %v21_v19 = vpop.permute.xlu1 %20  ;;  %v26_v24 = vpop.permute.xlu0 %25 }
  0x7f   :  { %vm23_vm1 = vcmp.eq.s32.totalorder %v13_v17, %v21_v19  ;;  %vm30_vm2 = vcmp.eq.s32.totalorder %v13_v17, %v26_v24 }
  0x80   :  { %vm33_vm4 = vmor %vm23_vm1, %vm31_vm0 }
  0x81   :  { %vm32_vm7 = vmor %vm22_vm3, %vm30_vm2 }
  0x82   :  { %vm815_vm8 = vmor %vm32_vm7, %vm40_vm6 }
  0x83   :  { %vm819_vm9 = vmor %vm33_vm4, %vm41_vm5  ;;  %459 = vmatmul.msk.f32.vlgmr.msra.gmra.mxu1 %vm815_vm8, %v541_v27  ;;  %v457_v29 = vsel %vm815_vm8, 1.0, %v542_v28 }
  0x84   :  { %v97_v35 = vsub.f32 %v457_v29, %v457_v29  ;;  %v458_v43 = vsel %vm819_vm9, 1.0, %v542_v28 }
  0x85   :  { %v105_v45 = vsub.f32 %v458_v43, %v458_v43 }
  0x86   :  { %268 = vmatmul.f32.vlgmr.msra.gmra.mxu2 %v97_v35  ;;  %v98_v44 = vand.u32 4294901760, %v97_v35 }
  0x87   :  { %v106_v51 = vand.u32 4294901760, %v105_v45 }
  0x88   :  { %312 = vmatmul.f32.vlgmr.msra.gmra.mxu3 %v98_v44  ;;  %v99_v49 = vsub.f32 %v97_v35, %v98_v44 }
  0x89   :  { %v107_v57 = vsub.f32 %v105_v45, %v106_v51 }
  0x8a   :  { %v100_v50 = vand.u32 4294901760, %v99_v49 }
  0x8b   :  { %460 = vmatmul.msk.f32.gmra.mxu1 %vm819_vm9, %v541_v27  ;;  %v108_v58 = vand.u32 4294901760, %v107_v57 }
  0x8c   :  { %101 = vmatmul.f32.vlgmr.msra.gmra.mxu0 %v100_v50 }
  0x8e   :  { %273 = vmatmul.f32.gmra.mxu2 %v105_v45 }
  0x90   :  { %318 = vmatmul.f32.gmra.mxu3 %v106_v51 }
  0x93   :  { %463 = vmatmul.msk.f32.vlgmr.msrb.gmra.mxu1 %vm815_vm8, %v541_v27 }
  0x94   :  { %109 = vmatmul.f32.gmra.mxu0 %v108_v58 }
  0x96   :  { %462 = vmatmul.msk.f32.vlgmr.msrb.gmra.mxu2 %vm819_vm9, %v541_v27 }
  0x98   :  { %464 = vmatmul.msk.f32.vlgmr.msrb.gmra.mxu3 %vm819_vm9, %v541_v27 }
  0x9c   :  { %461 = vmatmul.msk.f32.vlgmr.msrb.gmra.mxu0 %vm815_vm8, %v541_v27 }
 0x100   :  { %v211_v59 = vpop.f32.mrf.mxu1 }
 0x108   :  { %v215_v63 = vpop.f32.mrf.mxu1 }
 0x109   :  { %v102_v60 = vpop.f32.mrf.mxu0  ;;  %v269_v61 = vpop.f32.mrf.mxu2 }
 0x10a   :  { %v212_v0 = vadd.f32 %v211_v59, %v102_v60 }
 0x10b   :  { %v313_v62 = vpop.f32.mrf.mxu3 }
 0x10c   :  { %v270_v7 = vadd.f32 %v269_v61, %v212_v0 }
 0x10e   :  { %v314_v12 = vadd.f32 %v313_v62, %v270_v7 }
 0x110   :  { %v429_v21 = vpop.f32.mrf.mxu1 }
 0x111   :  { %v110_v1 = vpop.f32.mrf.mxu0  ;;  %v274_v3 = vpop.f32.mrf.mxu2 }
 0x112   :  { %v216_v5 = vadd.f32 %v215_v63, %v110_v1 }
 0x113   :  { %v319_v6 = vpop.f32.mrf.mxu3 }
 0x114   :  { %v275_v11 = vadd.f32 %v274_v3, %v216_v5 }
 0x116   :  { %v320_v13 = vadd.f32 %v319_v6, %v275_v11 }
 0x119   :  { %v388_v14 = vpop.f32.mrf.mxu0  ;;  %v392_v15 = vpop.f32.mrf.mxu2 }
 0x11a   :  { %v389_v16 = vadd.f32 %v388_v14, %v314_v12  ;;  %v393_v20 = vadd.f32 %v392_v15, %v320_v13 }
 0x11b   :  { %v433_v22 = vpop.f32.mrf.mxu3 }
 0x11c   :  { %v430_v23 = vadd.f32 %v429_v21, %v389_v16  ;;  %v434_v25 = vadd.f32 %v433_v22, %v393_v20 }
 0x11e   :  { %437 = vst.msk [vmem:[#allocation2] sm:$0xff] %vm436_vm10, %v430_v23 }
 0x11f   :  { %438 = vst.msk [vmem:[#allocation2 + $0x8] sm:$0xff] %vm436_vm10, %v434_v25 }
 0x120   :  { %451 = dma.vmem_to_hbm [thread:$0]  %s444_s16, 256, %s446_s19, [#allocation3], %s544_s20, %s544_s20, %s545_s21  }
 0x121   :  { %536 = dma.done.wait [#allocation3], 256  }
 0x122   :  { %537 = vsyncadd [#allocation3], 4294967040 }
 0x123   :  { %456 = vsyncpa [#allocation3], 1 }

</bundles_post_ra>
